<compile_context>
chip_gen: v7x
topology: tpu7x:2x2x1
jax: 0.10.0
libtpu: 0.0.40
codegen_flags: <defaults>
</compile_context>

<pallas_src>
import functools

import jax
import jax.numpy as jnp
from jax import lax
from jax.experimental import pallas as pl
from jax.experimental.pallas import tpu as pltpu


def _linear_kernel(x_ref, w_ref, b_ref, o_ref):
    # x_ref: (B, D)
    # w_ref: (C, D)  -- PyTorch nn.Linear layout, no host-side transpose
    # b_ref: (1, C)
    # o_ref: (B, C)
    x = x_ref[...]
    w = w_ref[...]
    b = b_ref[...]
    # x @ w.T done directly by the MXU via dot_general dimension numbers
    # (contract dim 1 of x with dim 1 of w); no in-kernel transpose.
    acc = lax.dot_general(
        x, w,
        dimension_numbers=(((1,), (1,)), ((), ())),
        preferred_element_type=jnp.float32,
    )
    o_ref[...] = (acc + b).astype(o_ref.dtype)


def prepare_params(weight, bias):
    """One-time parameter prep (keeps the per-call path free of reshapes).

    weight stays in PyTorch (num_classes, embed_dim) layout; bias is stored as
    (1, num_classes) so the in-kernel broadcast is layout-friendly.
    """
    num_classes = weight.shape[0]
    return weight, bias.reshape(1, num_classes)


@functools.partial(jax.jit, static_argnames=("batch_tile",))
def sentiment_classifier_forward(inp, weight, bias2d, *, batch_tile=512):
    """Pallas equivalent of SentimentClassifier.forward.

    Args:
      inp:     (batch, embed_dim) float32
      weight:  (num_classes, embed_dim) float32  (PyTorch nn.Linear layout)
      bias2d:  (1, num_classes) float32          (from prepare_params)
      batch_tile: rows per grid step when batch is large.
    Returns:
      logits: (batch, num_classes) float32
    """
    batch, embed_dim = inp.shape
    num_classes = weight.shape[0]
    out_shape = jax.ShapeDtypeStruct((batch, num_classes), jnp.float32)

    if batch <= batch_tile:
        # Whole problem is a single VMEM-resident tile: no grid, no pipeline.
        return pl.pallas_call(
            _linear_kernel,
            out_shape=out_shape,
            in_specs=[
                pl.BlockSpec(memory_space=pltpu.MemorySpace.VMEM),
                pl.BlockSpec(memory_space=pltpu.MemorySpace.VMEM),
                pl.BlockSpec(memory_space=pltpu.MemorySpace.VMEM),
            ],
            out_specs=pl.BlockSpec(memory_space=pltpu.MemorySpace.VMEM),
        )(inp, weight, bias2d)

    # Large-batch path: tile only the batch axis; weight/bias stay resident
    # (full-array blocks) across the grid.  Batch axis is "parallel" so it can
    # shard across TensorCores.
    tb = batch_tile
    return pl.pallas_call(
        _linear_kernel,
        out_shape=out_shape,
        grid=(pl.cdiv(batch, tb),),
        in_specs=[
            pl.BlockSpec((tb, embed_dim), lambda i: (i, 0)),
            pl.BlockSpec((num_classes, embed_dim), lambda i: (0, 0)),
            pl.BlockSpec((1, num_classes), lambda i: (0, 0)),
        ],
        out_specs=pl.BlockSpec((tb, num_classes), lambda i: (i, 0)),
        compiler_params=pltpu.CompilerParams(
            dimension_semantics=("parallel",)
        ),
    )(inp, weight, bias2d)


if __name__ == "__main__":
    # Small shapes consistent with the module: batch=8, embed_dim=32, classes=4
    batch, embed_dim, num_classes = 8, 32, 4

    key = jax.random.PRNGKey(0)
    k_x, k_w, k_b, k_xl = jax.random.split(key, 4)

    # Deterministic synthetic parameters (nn.Linear-like init scale).
    inp = jax.random.normal(k_x, (batch, embed_dim), dtype=jnp.float32)
    bound = 1.0 / (embed_dim ** 0.5)
    weight = jax.random.uniform(
        k_w, (num_classes, embed_dim), minval=-bound, maxval=bound,
        dtype=jnp.float32)
    bias = jax.random.uniform(
        k_b, (num_classes,), minval=-bound, maxval=bound, dtype=jnp.float32)

    w_prep, b_prep = prepare_params(weight, bias)   # one-time, outside hot path

    # --- small-batch (gridless) path ---
    logits = sentiment_classifier_forward(inp, w_prep, b_prep)
    logits = jax.block_until_ready(logits)
    ref = inp @ weight.T + bias
    assert logits.shape == (batch, num_classes)
    assert jnp.allclose(logits, ref, atol=1e-5, rtol=1e-5)

    # --- batch-tiled path (exercise the scaled-up code path too) ---
    big_batch = 1024
    inp_big = jax.random.normal(k_xl, (big_batch, embed_dim), dtype=jnp.float32)
    logits_big = sentiment_classifier_forward(
        inp_big, w_prep, b_prep, batch_tile=256)
    logits_big = jax.block_until_ready(logits_big)
    ref_big = inp_big @ weight.T + bias
    assert logits_big.shape == (big_batch, num_classes)
    assert jnp.allclose(logits_big, ref_big, atol=1e-5, rtol=1e-5)

    # TODO(synk): nn.CrossEntropyLoss is defined on the module but not used in
    # forward(), so it is intentionally not implemented here.
    print("KERNEL_OK")
</pallas_src>

<mosaic_0001>
module attributes {stable_mosaic.version = 11 : i64} {
  func.func @_linear_kernel(%arg0: memref<8x32xf32, #tpu.memory_space<vmem>>, %arg1: memref<4x32xf32, #tpu.memory_space<vmem>>, %arg2: memref<1x4xf32, #tpu.memory_space<vmem>>, %arg3: memref<8x4xf32, #tpu.memory_space<vmem>>) attributes {dimension_semantics = [], scalar_prefetch = 0 : i64, scratch_operands = 0 : i64, tpu.core_type = #tpu.core_type<tc>} {
    %c0 = arith.constant 0 : index
    %c0_0 = arith.constant 0 : index
    %0 = vector.load %arg0[%c0, %c0_0] : memref<8x32xf32, #tpu.memory_space<vmem>>, vector<8x32xf32>
    %c0_1 = arith.constant 0 : index
    %c0_2 = arith.constant 0 : index
    %1 = vector.load %arg1[%c0_1, %c0_2] : memref<4x32xf32, #tpu.memory_space<vmem>>, vector<4x32xf32>
    %c0_3 = arith.constant 0 : index
    %c0_4 = arith.constant 0 : index
    %2 = vector.load %arg2[%c0_3, %c0_4] : memref<1x4xf32, #tpu.memory_space<vmem>>, vector<1x4xf32>
    %cst = arith.constant dense<0.000000e+00> : vector<8x4xf32>
    %3 = tpu.matmul %0, %1, %cst {dimension_numbers = #tpu.dot_dimension_numbers<[1], [1], [0], [0], [0, 0, 1, 0], [], []>} : vector<8x32xf32>, vector<4x32xf32>, vector<8x4xf32> -> vector<8x4xf32>
    %4 = vector.broadcast %2 : vector<1x4xf32> to vector<8x4xf32>
    %5 = arith.addf %3, %4 : vector<8x4xf32>
    %c0_5 = arith.constant 0 : index
    %c0_6 = arith.constant 0 : index
    %6 = vector.load %arg3[%c0_5, %c0_6] : memref<8x4xf32, #tpu.memory_space<vmem>>, vector<8x4xf32>
    tpu.vector_store %arg3[%c0_5, %c0_6], %5 {strides = array<i32>} : memref<8x4xf32, #tpu.memory_space<vmem>>, vector<8x4xf32>,
    return
  }
}

</mosaic_0001>

<bundles_post_ra>
// kernel: sentiment_classifier_forward.1
= control target key start
LH: loop header
LB: loop body
LE: loop exit
PB: predicated region body
PF: predicated region fallthrough
CT: control target
= control target key end

     0   :  { %8 = vsyncpa [#allocation3], 0  ;;  %s248_s0 = inlined_call_operand.hbm [shape: f32[8,32], index: 0, kind: input, shape index: {}]   ;;  %s249_s1 = inlined_call_operand.hbm [shape: f32[4,32], index: 1, kind: input, shape index: {}]   ;;  %s250_s2 = inlined_call_operand.vmem [shape: f32[1,4], index: 2, kind: input, shape index: {}]   ;;  %s251_s3 = inlined_call_operand.vmem [shape: f32[8,4], index: 3, kind: output, shape index: {}]  }
   0x1   :  { %9 = vsyncpa [#allocation5], 0  ;;  %s194_s12 = smov [#allocation2]   ;;  %s195_s14 = smov [#allocation4]  }
   0x2   :  { %s16_s13 = sshll.u32 %s194_s12, 4  ;;  %s26_s15 = sshll.u32 %s195_s14, 4  ;;  %s17_s13 = int_to_ptr.vmem [resolvable:$true] %s16_s13  ;;  %s27_s15 = int_to_ptr.vmem [resolvable:$true] %s26_s15 }
   0x3   :  { %s146_s18 = scalar_lea.hbm %s248_s0, 128 }
   0x4   :  { %p147_p0 = scmp.ne.s32.totalorder %s248_s0, %s146_s18  ;;  %p150_p1 = scmp.lt.u32.totalorder %s146_s18, %s248_s0 }
   0x6   :  { %p152_p2 = pnand %p150_p1, %p147_p0 }
   0x8   :  { %155 = shalt.err (!%p152_p2)
}
   0x9   :  { %s156_s23 = scalar_lea.vmem %s17_s13, 128  ;;  %p161_p4 = scmp.lt.s32.totalorder %s17_s13, %s17_s13 }
   0xa   :  { %p157_p3 = scmp.ne.s32.totalorder %s17_s13, %s156_s23  ;;  %p162_p5 = scmp.lt.s32.totalorder %s156_s23, %s156_s23 }
   0xc   :  { %p163_p6 = por %p162_p5, %p161_p4 }
   0xe   :  { %p164_p7 = pnand %p163_p6, %p157_p3 }
  0x10   :  { %167 = shalt.err (!%p164_p7)
}
  0x11   :  { %19 = dma.hbm_to_vmem [thread:$0]  %s248_s0, 128, %s17_s13, [#allocation3]  }
  0x12   :  { %s168_s28 = scalar_lea.hbm %s249_s1, 64 }
  0x13   :  { %p169_p8 = scmp.ne.s32.totalorder %s249_s1, %s168_s28  ;;  %p172_p9 = scmp.lt.u32.totalorder %s168_s28, %s249_s1 }
  0x15   :  { %p174_p10 = pnand %p172_p9, %p169_p8 }
  0x17   :  { %177 = shalt.err (!%p174_p10)
}
  0x18   :  { %s178_s6 = scalar_lea.vmem %s27_s15, 64  ;;  %p183_p12 = scmp.lt.s32.totalorder %s27_s15, %s27_s15 }
  0x19   :  { %p179_p11 = scmp.ne.s32.totalorder %s27_s15, %s178_s6  ;;  %p184_p13 = scmp.lt.s32.totalorder %s178_s6, %s178_s6 }
  0x1b   :  { %p185_p0 = por %p184_p13, %p183_p12 }
  0x1d   :  { %p186_p1 = pnand %p185_p0, %p179_p11 }
  0x1f   :  { %189 = shalt.err (!%p186_p1)
}
  0x20   :  { %29 = dma.hbm_to_vmem [thread:$0]  %s249_s1, 64, %s27_s15, [#allocation5]  }
  0x21   :  { %190 = dma.done.wait [#allocation3], 128  }
  0x22   :  { %191 = vsyncadd [#allocation3], 4294967168 }
  0x23   :  { %192 = dma.done.wait [#allocation5], 64  }
  0x24   :  { %193 = vsyncadd [#allocation5], 4294967232  ;;  %v196_v0 = vmov 0.0   ;;  %vm197_vm0 = vmmov 0   ;;  %vm47_vm1 = vcmask 261120   ;;  %v38_v2 = vld [vmem:[#allocation2] sm:$0xff] }
  0x25   :  { %137 = vmatprep.subr.mxu0 %v196_v0  ;;  %139 = vmatprep.mubr.msk.f32.mxu0 %vm197_vm0, %v196_v0  ;;  %v39_v1 = vld [vmem:[#allocation4] sm:$0xf]  ;;  %v132_v3 = vld [vmem:[%s250_s2] ss:$0 sm:$0xff]  ;;  %vm124_vm2 = vcmask 31744  }
  0x26   :  { %138 = vmatpush3.xpose.msk.msra.mxu0 %vm47_vm1, %v39_v1 }
  0x29   :  { %140 = vmatmul.mubr.msk.f32.vlgmr.msra.gmra.mrb[0].mxu0 %vm47_vm1, %v38_v2 }
  0xfc   :  { %v120_v4 = vpop.f32.mrb[0].mxu0 }
  0xfd   :  { %v121_v5 = vadd.f32 %v132_v3, %v120_v4  ;;  %v141_v6 = vpop.f32.mrb[1].mxu0 }
  0xff   :  { %125 = vst.msk [vmem:[%s251_s3] sm:$0xff] %vm124_vm2, %v121_v5 }
 0x100   :  { %130 = vsyncpa [#allocation3], 1 }
 0x101   :  { %131 = vsyncpa [#allocation5], 1 }

</bundles_post_ra>
